<compile_context>
chip_gen: v7x
topology: tpu7x:2x2x1
jax: 0.10.0
libtpu: 0.0.40
codegen_flags: <defaults>
</compile_context>

<pallas_src>
import functools

import jax
import jax.numpy as jnp
from jax.experimental import pallas as pl
from jax.experimental.pallas import tpu as pltpu


def _downsample_a_kernel(x_ref, o_ref, *, stride):
    # x_ref: (Nb, C, H, W)            one block of samples
    # o_ref: (Nb, 2*C, H_out, W_out)  channels [0,C) = strided subsample, [C,2C) = zeros
    Nb, C, _, W = x_ref.shape
    H_out, W_out = o_ref.shape[2], o_ref.shape[3]

    # H-stride: sublane-strided load (rows 0, s, 2s, ...).
    if stride == 1:
        xh = x_ref[...]                                            # (Nb, C, H, W)
    else:
        xh = x_ref[:, :, pl.ds(0, H_out, stride=stride), :]        # (Nb, C, H_out, W)

    # W-stride: tiny 0/1 selection matrix built in-register (iota compare), used as an
    # MXU lane-gather.  Shape (W, W_out) -- a few KiB at most, never DMA'd.
    rows = jax.lax.broadcasted_iota(jnp.int32, (W, W_out), 0)
    cols = jax.lax.broadcasted_iota(jnp.int32, (W, W_out), 1)
    sel = (rows == cols * stride).astype(x_ref.dtype)

    lhs = xh.reshape(Nb * C * H_out, W)
    d = jnp.dot(lhs, sel, preferred_element_type=jnp.float32)
    d = d.reshape(Nb, C, H_out, W_out).astype(o_ref.dtype)

    # Disjoint stores (no redundant double-write of the data half).
    o_ref[:, 0:C, :, :] = d
    o_ref[:, C:2 * C, :, :] = jnp.zeros_like(d)


def _pick_block_n(N, per_sample_bytes):
    """Largest divisor of N whose (in+out) block stays ~4 MiB and that keeps at least
    2 grid steps (so v7x's two TensorCores both get work)."""
    budget = 4 << 20
    cap = max(1, min(N, budget // max(per_sample_bytes, 1)))
    if N >= 2:
        cap = min(cap, N // 2)
    cap = max(cap, 1)
    for b in range(cap, 0, -1):
        if N % b == 0:
            return b
    return 1


def downsample_a(x, *, stride, block_n=None):
    """x: (N, C, H, W) -> (N, 2*C, H_out, W_out); H_out = floor((H-1)/stride) + 1."""
    N, C, H, W = x.shape
    H_out = (H - 1) // stride + 1
    W_out = (W - 1) // stride + 1

    if block_n is None:
        itemsize = jnp.dtype(x.dtype).itemsize
        per_sample = (C * H * W + 2 * C * H_out * W_out) * itemsize
        block_n = _pick_block_n(N, per_sample)

    kern = functools.partial(_downsample_a_kernel, stride=stride)
    return pl.pallas_call(
        kern,
        out_shape=jax.ShapeDtypeStruct((N, 2 * C, H_out, W_out), x.dtype),
        grid=(N // block_n,),
        in_specs=[pl.BlockSpec((block_n, C, H, W), lambda n: (n, 0, 0, 0))],
        out_specs=pl.BlockSpec((block_n, 2 * C, H_out, W_out), lambda n: (n, 0, 0, 0)),
        compiler_params=pltpu.CompilerParams(
            dimension_semantics=("parallel",),
            vmem_limit_bytes=32 * 1024 * 1024,
        ),
    )(x)


if __name__ == "__main__":
    key = jax.random.PRNGKey(0)
    x = jax.random.normal(key, (2, 4, 16, 16), jnp.float32)  # NCHW, like PyTorch
    stride = 2

    fwd = jax.jit(functools.partial(downsample_a, stride=stride))
    out = fwd(x)
    jax.block_until_ready(out)

    # Reference: AvgPool2d(kernel_size=1, stride) == strided subsample; concat zeros on channels.
    d_ref = x[:, :, ::stride, ::stride]
    ref = jnp.concatenate([d_ref, jnp.zeros_like(d_ref)], axis=1)

    assert out.shape == (2, 8, 8, 8), out.shape
    assert out.dtype == x.dtype
    assert jnp.allclose(out, ref, atol=1e-6), float(jnp.max(jnp.abs(out - ref)))
    print("KERNEL_OK")
</pallas_src>

<mosaic_0001>
module attributes {stable_mosaic.version = 11 : i64} {
  func.func @_downsample_a_kernel(%arg0: i32, %arg1: memref<1x4x16x16xf32, #tpu.memory_space<vmem>>, %arg2: memref<1x8x8x8xf32, #tpu.memory_space<vmem>>) attributes {dimension_semantics = [#tpu.dimension_semantics<parallel>], iteration_bounds = array<i64: 2>, scalar_prefetch = 0 : i64, scratch_operands = 0 : i64, tpu.core_type = #tpu.core_type<tc>, window_params = [{transform_indices = @transform_0, window_bounds = array<i64: 1, 4, 16, 16>}, {transform_indices = @transform_1, window_bounds = array<i64: 1, 8, 8, 8>}]} {
    %c0 = arith.constant 0 : index
    %c0_0 = arith.constant 0 : index
    %c0_1 = arith.constant 0 : index
    %c0_2 = arith.constant 0 : index
    %0 = tpu.strided_load %arg1[%c0, %c0_0, %c0_1, %c0_2] {strides = array<i32: 1, 1, 2, 1>} : memref<1x4x16x16xf32, #tpu.memory_space<vmem>>, vector<1x4x8x16xf32>
    %1 = tpu.iota {dimensions = array<i32: 0>} : vector<16x8xi32>
    %2 = tpu.iota {dimensions = array<i32: 1>} : vector<16x8xi32>
    %c2_i32 = arith.constant 2 : i32
    %3 = vector.broadcast %c2_i32 : i32 to vector<16x8xi32>
    %4 = arith.muli %2, %3 : vector<16x8xi32>
    %5 = arith.cmpi eq, %1, %4 : vector<16x8xi32>
    %6 = arith.extui %5 : vector<16x8xi1> to vector<16x8xi32>
    %7 = arith.sitofp %6 : vector<16x8xi32> to vector<16x8xf32>
    %8 = vector.shape_cast %0 : vector<1x4x8x16xf32> to vector<32x16xf32>
    %cst = arith.constant dense<0.000000e+00> : vector<32x8xf32>
    %9 = tpu.matmul %8, %7, %cst {dimension_numbers = #tpu.dot_dimension_numbers<[1], [0], [0], [1], [0, 0, 1, 1], [], []>} : vector<32x16xf32>, vector<16x8xf32>, vector<32x8xf32> -> vector<32x8xf32>
    %10 = vector.shape_cast %9 : vector<32x8xf32> to vector<1x4x8x8xf32>
    %c0_3 = arith.constant 0 : index
    %c0_4 = arith.constant 0 : index
    %c0_5 = arith.constant 0 : index
    %c0_6 = arith.constant 0 : index
    %11 = vector.load %arg2[%c0_3, %c0_4, %c0_5, %c0_6] : memref<1x8x8x8xf32, #tpu.memory_space<vmem>>, vector<1x4x8x8xf32>
    tpu.vector_store %arg2[%c0_3, %c0_4, %c0_5, %c0_6], %10 {strides = array<i32>} : memref<1x8x8x8xf32, #tpu.memory_space<vmem>>, vector<1x4x8x8xf32>,
    %cst_7 = arith.constant 0.000000e+00 : f32
    %12 = vector.broadcast %cst_7 : f32 to vector<1x4x8x8xf32>
    %c0_8 = arith.constant 0 : index
    %c4 = arith.constant 4 : index
    %c0_9 = arith.constant 0 : index
    %c0_10 = arith.constant 0 : index
    %13 = vector.load %arg2[%c0_8, %c4, %c0_9, %c0_10] : memref<1x8x8x8xf32, #tpu.memory_space<vmem>>, vector<1x4x8x8xf32>
    tpu.vector_store %arg2[%c0_8, %c4, %c0_9, %c0_10], %12 {strides = array<i32>} : memref<1x8x8x8xf32, #tpu.memory_space<vmem>>, vector<1x4x8x8xf32>,
    return
  }
  func.func @transform_0(%arg0: i32) -> (i32, i32, i32, i32) {
    %c0_i32 = arith.constant 0 : i32
    %c0_i32_0 = arith.constant 0 : i32
    %c0_i32_1 = arith.constant 0 : i32
    %c0_i32_2 = arith.constant 0 : i32
    return %arg0, %c0_i32, %c0_i32_0, %c0_i32_1 : i32, i32, i32, i32
  }
  func.func @transform_1(%arg0: i32) -> (i32, i32, i32, i32) {
    %c0_i32 = arith.constant 0 : i32
    %c0_i32_0 = arith.constant 0 : i32
    %c0_i32_1 = arith.constant 0 : i32
    %c0_i32_2 = arith.constant 0 : i32
    return %arg0, %c0_i32, %c0_i32_0, %c0_i32_1 : i32, i32, i32, i32
  }
}

</mosaic_0001>

<bundles_post_ra>
// kernel: downsample_a.1
= control target key start
LH: loop header
LB: loop body
LE: loop exit
PB: predicated region body
PF: predicated region fallthrough
CT: control target
= control target key end

     0   :  { %6 = vsyncpa [#allocation3], 0  ;;  %s740_s0 = inlined_call_operand.hbm [shape: f32[2,4,16,16], index: 0, kind: input, shape index: {}]   ;;  %s741_s1 = inlined_call_operand.hbm [shape: f32[2,8,8,8], index: 1, kind: output, shape index: {}]  }
   0x1   :  { %8 = vsyncpa [#allocation3 + $0x1], 0 }
   0x2   :  { %9 = vsyncpa [#allocation4], 0 }
   0x3   :  { %11 = vsyncpa [#allocation4 + $0x1], 0  ;;  %s570_s6 = smov 0   ;;  %s572_s7 = smov 0  }
   0x4   :  { %s574_s8 = smov 0   ;;  %s576_s9 = smov 0  }
   0x5 LB: > { %s591_s10 = sadd.s32 4294967295, %s550_s9   ;;  %s349_s11 = sadd.s32 4294967294, %s550_s9   ;;  %s550_s9 = sphi %s576_s9, %s754_s9   ;;  %s546_s8 = sphi %s574_s8, %s753_s8   ;;  %s542_s7 = sphi %s572_s7, %s752_s7   ;;  %s538_s6 = sphi %s570_s6, %s751_s6  }
   0x6   : > { %s595_s12 = sadd.s32 1, %s550_s9   ;;  %s24_s13 = sadd.s32 1, %s546_s8 }
   0x7   : > { %s21_s14 = ssub.s32 %s550_s9, %s595_s12  ;;  %p31_p0 = scmp.ne.s32.totalorder %s546_s8, %s542_s7 }
   0x8   : > { %p22_p1 = scmp.eq.s32.totalorder %s21_s14, 0  ;;  %p32_p2 = scmp.eq.s32.totalorder %s550_s9, 0 }
   0x9   : > { %p37_p3 = scmp.ne.s32.totalorder %s542_s7, %s538_s6  ;;  %p38_p4 = scmp.eq.s32.totalorder %s591_s10, 0 }
   0xa   : > { %s607_s15 = scalar_select %p22_p1, %s546_s8, %s24_s13  }
   0xb   : > { %p609_p5 = por %p32_p2, %p31_p0  ;;  %p613_p6 = por %p38_p4, %p37_p3 }
   0xc   : > { %p61_p7 = scmp.eq.s32.totalorder %s591_s10, 1  ;;  %p67_p8 = scmp.eq.s32.totalorder %s349_s11, 1 }
   0xd   : > { %p414_p10 = scmp.lt.s32.totalorder %s550_s9, 2  ;;  %s87_s20 = sand.u32 1, %s546_s8  }
   0xe   : > { %p620_p11 = por %p61_p7, %p31_p0  ;;  %p624_p12 = por %p67_p8, %p37_p3 }
   0xf   : > { %s378_s21 = sshll.u32 %s550_s9, 10  ;;  %s352_s22 = sshll.u32 %s87_s20, 6 }
  0x10   : > { %s745_s18 = scalar_select %p620_p11, 1, 0 }
  0x11   : > { %s746_s19 = scalar_select %p624_p12, 1, 0 }
  0x12   : > { %s633_s25 = scalar_lea.hbm %s740_s0, %s378_s21  ;;  %s91_s26 = scalar_lea.vmem [#allocation2], %s352_s22 }
  0x13   : > { %s98_s27 = sshll.u32 %s91_s26, 4  ;;  %p637_p13 = pnand %p414_p10, %p609_p5  ;;  %s641_s27 = int_to_ptr.vmem [resolvable:$true] %s98_s27 }
  0x14   : > { %s643_s29 = scalar_lea.sflag [#allocation3], %s87_s20  ;;  %s454_s30 = scalar_lea.hbm %s633_s25, 1024 }
  0x15   : > { %p455_p0 = scmp.ne.s32.totalorder %s633_s25, %s454_s30  ;;  %p456_p1 = pneg %p637_p13 }
  0x16   : > { %s459_s4 = scalar_lea.hbm %s740_s0, 2048  ;;  %p460_p4 = scmp.lt.u32.totalorder %s633_s25, %s740_s0 }
  0x17   : > { %p457_p2 = pnand %p456_p1, %p455_p0  ;;  %p461_p5 = scmp.lt.u32.totalorder %s459_s4, %s454_s30 }
  0x18   : > { %p463_p8 = scmp.lt.u32.totalorder %s454_s30, %s633_s25 }
  0x19   : > { %p458_p3 = pneg %p457_p2  ;;  %p462_p7 = por %p461_p5, %p460_p4 }
  0x1b   : > { %p464_p10 = por %p463_p8, %p462_p7 }
  0x1d   : > { %p465_p9 = pnand %p464_p10, %p458_p3 }
  0x1f   : > { %468 = shalt.err (!%p465_p9)
}
  0x20   : > { %s469_s13 = scalar_lea.vmem %s641_s27, 1024  ;;  %s552_s14 = smov [#allocation2]  }
  0x21   : > { %p470_p0 = scmp.ne.s32.totalorder %s641_s27, %s469_s13  ;;  %s474_s16 = sshll.u32 %s552_s14, 4  ;;  %s475_s16 = int_to_ptr.vmem [resolvable:$false] %s474_s16 }
  0x22   : > { %s476_s20 = scalar_lea.vmem %s475_s16, 2048  ;;  %p477_p11 = scmp.lt.s32.totalorder %s641_s27, %s475_s16 }
  0x23   : > { %p472_p2 = pnand %p470_p0, %p456_p1  ;;  %p478_p4 = scmp.lt.s32.totalorder %s476_s20, %s469_s13 }
  0x25   : > { %p473_p12 = pneg %p472_p2  ;;  %p479_p5 = por %p478_p4, %p477_p11 }
  0x27   : > { %p480_p7 = pnand %p479_p5, %p473_p12 }
  0x29   : > { %483 = shalt.err (!%p480_p7)
}
  0x2a   : > { %s553_s21 = smov 128   ;;  %s554_s22 = smov 8  }
  0x2b   : > { %409 = dma.hbm_to_vmem [thread:$0]  (!%p637_p13), %s633_s25, 1024, %s641_s27, %s643_s29, %s553_s21, %s553_s21, %s554_s22  }
  0x2c   : > { %p355_p9 = scmp.ge.s32.totalorder %s550_s9, 1  ;;  %p106_p1 = scmp.lt.s32.totalorder %s550_s9, 3 }
  0x2e   : > { %p107_p3 = pnand %p355_p9, %p106_p1 }
  0x2f   : > { %s674_s23 = sand.u32 (!%p107_p3), 1, %s542_s7  }
  0x30   : > { %110 = sbr.rel (%p107_p3) target bundleno = 296 (0x128), region = 24  ;;  %s356_s24 = sshll.u32 (!%p107_p3), %s674_s23, 6 }
  0x31   : > { %s113_s26 = scalar_lea.sflag (!%p107_p3), [#allocation3], %s674_s23  ;;  %s116_s30 = scalar_lea.vmem (!%p107_p3), [#allocation2], %s356_s24 }
  0x37   : > { %529 = dma.done.wait (%p613_p6), %s113_s26, 1024  }
  0x38   : > { %531 = vsyncadd (%p613_p6), %s113_s26, 4294966272  ;;  %v142_v0 = vlaneseq  ;;  %v135_v5 = vld [vmem:[%s116_s30] ss:$2 sm:$0xff]  ;;  %vm154_vm3 = vcmask 130048   ;;  %v555_v7 = vmov 1.0|1.0  }
  0x39   : > { %v359_v6 = vld [vmem:[%s116_s30 + $0x20] ss:$2 sm:$0xff]  ;;  %v358_v8 = vld [vmem:[%s116_s30 + $0x10] ss:$2 sm:$0xff]  ;;  %390 = vmatprep.mubr.msk.f32.mxu0 %vm154_vm3, %v135_v5  ;;  %vm252_vm4 = vcmask 64512   ;;  %s134_s17 = scalar_lea.vmem [#allocation5], %s356_s24 }
  0x3a   : > { %v143_v1 = vshrl.u32 %v142_v0, 7  ;;  %v146_v2 = vand.u32 127, %v142_v0  ;;  %v360_v9 = vld [vmem:[%s116_s30 + $0x30] ss:$2 sm:$0xff]  ;;  %393 = vmatprep.mubr.msk.f32.mxu1 %vm154_vm3, %v359_v6  ;;  %v556_v10 = vmov 0.0   ;;  %s276_s25 = sshll.u32 %s134_s17, 4  ;;  %s687_s25 = int_to_ptr.vmem [resolvable:$true] %s276_s25 }
  0x3b   : > { %369 = vst.msk [vmem:[%s134_s17 + $0x20] sm:$0xff] %vm252_vm4, %v556_v10  ;;  %370 = vst.msk [vmem:[%s134_s17 + $0x28] sm:$0xff] %vm252_vm4, %v556_v10  ;;  %s379_s27 = sshll.u32 %s591_s10, 10  ;;  %s263_s10 = scalar_lea.sflag [#allocation4], %s674_s23 }
  0x3c   : > { %v144_v3 = vadd.s32 8, %v143_v1  ;;  %v147_v4 = vmul.u32 2, %v146_v2  ;;  %371 = vst.msk [vmem:[%s134_s17 + $0x30] sm:$0xff] %vm252_vm4, %v556_v10  ;;  %372 = vst.msk [vmem:[%s134_s17 + $0x38] sm:$0xff] %vm252_vm4, %v556_v10  ;;  %s692_s2 = scalar_lea.hbm %s741_s1, %s379_s27  ;;  %s484_s3 = scalar_lea.vmem %s687_s25, 1024 }
  0x3d   : > { %p485_p6 = scmp.ne.s32.totalorder %s687_s25, %s484_s3  ;;  %p748_p11 = scmp.ne.s32.totalorder %s745_s18, 0 }
  0x3e   : > { %vm148_vm0 = vcmp.eq.s32.totalorder %v143_v1, %v147_v4  ;;  %vm149_vm1 = vcmp.eq.s32.totalorder %v144_v3, %v147_v4  ;;  %s557_s4 = smov [#allocation5]  }
  0x3f   : > { %vm396_vm2 = vmpackc.low %vm149_vm1, %vm148_vm0  ;;  %p486_p12 = pnand %p485_p6, %p748_p11  ;;  %s488_s5 = sshll.u32 %s557_s4, 4  ;;  %s489_s5 = int_to_ptr.vmem [resolvable:$false] %s488_s5 }
  0x40   : > { %397 = vmatprep.subr.msk.bf16.mxu0 %vm396_vm2, %v555_v7  ;;  %400 = vmatprep.subr.msk.bf16.mxu1 %vm396_vm2, %v555_v7  ;;  %s490_s11 = scalar_lea.vmem %s489_s5, 2048  ;;  %p491_p8 = scmp.lt.s32.totalorder %s687_s25, %s489_s5 }
  0x41   : > { %399 = vmatpush3.bf16.msk.msra.mxu0 %vm396_vm2, %v555_v7  ;;  %401 = vmatpush3.bf16.msk.msra.mxu1 %vm396_vm2, %v555_v7  ;;  %p487_p13 = pneg %p486_p12  ;;  %p492_p10 = scmp.lt.s32.totalorder %s490_s11, %s484_s3 }
  0x43   : > { %p493_p0 = por %p492_p10, %p491_p8 }
  0x44   : > { %391 = vmatmul.mubr.msk.f32.vlgmr.msra.gmra.mrb[0].mxu0 %vm154_vm3, %v358_v8  ;;  %394 = vmatmul.mubr.msk.f32.vlgmr.msra.gmra.mrb[0].mxu1 %vm154_vm3, %v360_v9 }
  0x45   : > { %p494_p2 = pnand %p493_p0, %p487_p13 }
 0x117   : > { %v392_v11 = vpop.f32.mrb[0].mxu0  ;;  %v395_v12 = vpop.f32.mrb[0].mxu1 }
 0x118   : > { %254 = vst.msk [vmem:[%s134_s17 + $0x8] sm:$0xff] %vm252_vm4, %v392_v11  ;;  %256 = vst.msk [vmem:[%s134_s17 + $0x18] sm:$0xff] %vm252_vm4, %v395_v12  ;;  %v233_v13 = vpop.f32.mrb[1].mxu0  ;;  %v243_v14 = vpop.f32.mrb[1].mxu1 }
 0x119   : > { %253 = vst.msk [vmem:[%s134_s17] sm:$0xff] %vm252_vm4, %v233_v13  ;;  %255 = vst.msk [vmem:[%s134_s17 + $0x10] sm:$0xff] %vm252_vm4, %v243_v14 }
 0x11a   : > { %497 = shalt.err (!%p494_p2)
}
 0x11b   : > { %s498_s13 = scalar_lea.hbm %s692_s2, 1024  ;;  %s502_s20 = scalar_lea.hbm %s741_s1, 2048 }
 0x11c   : > { %p499_p4 = scmp.ne.s32.totalorder %s692_s2, %s498_s13  ;;  %p503_p9 = scmp.lt.u32.totalorder %s692_s2, %s741_s1 }
 0x11d   : > { %p504_p1 = scmp.lt.u32.totalorder %s502_s20, %s498_s13  ;;  %p506_p6 = scmp.lt.u32.totalorder %s498_s13, %s692_s2 }
 0x11e   : > { %p500_p5 = pnand %p499_p4, %p748_p11 }
 0x11f   : > { %p505_p3 = por %p504_p1, %p503_p9 }
 0x120   : > { %p501_p7 = pneg %p500_p5 }
 0x121   : > { %p507_p12 = por %p506_p6, %p505_p3 }
 0x123   : > { %p508_p13 = pnand %p507_p12, %p501_p7 }
 0x125   : > { %511 = shalt.err (!%p508_p13)
}
 0x126   : > { %s558_s24 = smov 128   ;;  %s559_s26 = smov 8  }
 0x127   : > { %404 = dma.vmem_to_hbm [thread:$0]  (%p748_p11), %s687_s25, 1024, %s692_s2, %s263_s10, %s558_s24, %s558_s24, %s559_s26  }
 0x128 PF: > { %s291_s30 = sand.u32 1, %s538_s6   ;;  %p749_p8 = scmp.ne.s32.totalorder %s746_s19, 0 }
 0x129   : > { %p750_p10 = scmp.ge.s32.totalorder %s550_s9, 2  ;;  %s292_s17 = scalar_lea.sflag [#allocation4], %s291_s30 }
 0x12b   : > { %p411_p0 = pnand %p750_p10, %p749_p8 }
 0x12d   : > { %533 = dma.done.wait (!%p411_p0), %s292_s17, 1024  }
 0x12e   : > { %535 = vsyncadd (!%p411_p0), %s292_s17, 4294966272  ;;  %p14_p2 = scmp.ge.s32.totalorder %s595_s12, 4   ;;  %s751_s6 = smov %s542_s7 }
 0x12f   : > { %s752_s7 = smov %s546_s8  ;;  %s753_s8 = smov %s607_s15 }
 0x130   : > { %s754_s9 = smov %s595_s12  ;;  %16 = sbr.rel (!%p14_p2) target bundleno = 5 (0x5), region = 73 }
 0x137   :  { %297 = vsyncpa [#allocation3], 1 }
 0x138   :  { %299 = vsyncpa [#allocation3 + $0x1], 1 }
 0x139   :  { %300 = vsyncpa [#allocation4], 1 }
 0x13a   :  { %302 = vsyncpa [#allocation4 + $0x1], 1 }

</bundles_post_ra>
